<compile_context>
chip_gen: v6e
topology: v6e:2x2x1
jax: 0.10.0
libtpu: 0.0.40
codegen_flags: <defaults>
</compile_context>

<pallas_src>
import functools

import jax
import jax.numpy as jnp
from jax import lax
from jax.experimental import pallas as pl
from jax.experimental.pallas import tpu as pltpu


def _gem_kernel(p_ref, x_ref, o_ref, acc_ref, *, eps, hw_total, tile_hw, mask_hw):
    # p_ref   : SMEM, shape (1,)                   -- learnable exponent
    # x_ref   : VMEM, shape (TILE_NC, TILE_HW)     -- one (NC-tile, HW-tile) block
    # o_ref   : VMEM, shape (1, TILE_NC)           -- lane-dense per-row output
    # acc_ref : VMEM scratch, (TILE_NC, 1) f32     -- running sum over HW
    k = pl.program_id(1)
    last = pl.num_programs(1) - 1

    @pl.when(k == 0)
    def _init():
        acc_ref[...] = jnp.zeros_like(acc_ref)

    p = p_ref[0]
    x = x_ref[...].astype(jnp.float32)               # (TILE_NC, TILE_HW)
    xc = jnp.maximum(x, eps)                         # clamp(min=eps) > 0

    def _accumulate(xp):
        if mask_hw:
            # Tail masking is only needed on the final HW tile; keep the hot
            # steps free of iota/compare/select work.
            @pl.when(k != last)
            def _full_tile():
                acc_ref[...] += jnp.sum(xp, axis=-1, keepdims=True)

            @pl.when(k == last)
            def _tail_tile():
                lane = lax.broadcasted_iota(jnp.int32, (1, xp.shape[-1]), 1)
                valid = lane < (hw_total - k * tile_hw)
                acc_ref[...] += jnp.sum(
                    jnp.where(valid, xp, 0.0), axis=-1, keepdims=True
                )
        else:
            acc_ref[...] += jnp.sum(xp, axis=-1, keepdims=True)

    # Runtime fast path for the common integer exponent p == 3 (module default):
    # two VPU multiplies instead of exp/log on the EUP.
    is_p3 = p == jnp.float32(3.0)

    @pl.when(is_p3)
    def _pow_fast():
        _accumulate(xc * xc * xc)

    @pl.when(jnp.logical_not(is_p3))
    def _pow_general():
        _accumulate(jnp.exp(p * jnp.log(xc)))        # x**p via exp/log (EUP)

    @pl.when(k == last)
    def _finalize():
        m = acc_ref[...] * (1.0 / hw_total)          # mean over the TRUE H*W
        out = jnp.exp(jnp.log(m) * (1.0 / p))        # m ** (1/p), m > 0
        o_ref[...] = out.reshape(o_ref.shape).astype(o_ref.dtype)


def gem_pallas(x, p, eps=1e-6, *, max_tile_hw=4096):
    """x: (N, C, H, W); p: (1,) float32 parameter. Returns (N, C, 1, 1)."""
    N, C, H, W = x.shape
    hw = H * W
    nc = N * C
    xr = x.reshape(nc, hw)                           # contiguous view, free in XLA

    # --- Tile selection -----------------------------------------------------
    # NC tile: take the full dim when small (always layout-legal); otherwise a
    # multiple of 128 so the lane-dense output block is legal, picked so the
    # parallel grid axis has >= 2 blocks (both v7x TensorCores get work).
    if nc <= 128:
        tile_nc = nc
    elif pl.cdiv(nc, 256) >= 2:
        tile_nc = 256
    else:
        tile_nc = 128
    # HW tile: full dim when small; otherwise `max_tile_hw` lanes (must be a
    # multiple of 128).  Default 4096 -> <= 4 MiB f32 per block, comfortably
    # double-buffered on every generation's VMEM budget.
    tile_hw = hw if hw <= max_tile_hw else max_tile_hw

    n_nc = pl.cdiv(nc, tile_nc)
    n_hw = pl.cdiv(hw, tile_hw)
    mask_hw = (hw % tile_hw) != 0

    kernel = functools.partial(
        _gem_kernel, eps=eps, hw_total=hw, tile_hw=tile_hw, mask_hw=mask_hw
    )

    out = pl.pallas_call(
        kernel,
        out_shape=jax.ShapeDtypeStruct((1, nc), x.dtype),
        grid=(n_nc, n_hw),
        in_specs=[
            pl.BlockSpec(memory_space=pltpu.SMEM),                   # p scalar
            pl.BlockSpec((tile_nc, tile_hw), lambda i, k: (i, k)),   # x block
        ],
        out_specs=pl.BlockSpec((1, tile_nc), lambda i, k: (0, i)),
        scratch_shapes=[pltpu.VMEM((tile_nc, 1), jnp.float32)],
        compiler_params=pltpu.CompilerParams(
            dimension_semantics=("parallel", "arbitrary"),
            vmem_limit_bytes=32 * 1024 * 1024,
        ),
    )(p, xr)

    return out.reshape(N, C, 1, 1)


def gem_reference(x, p, eps=1e-6):
    """Pure-JAX reference mirroring the PyTorch gem() function."""
    pv = p[0]
    xc = jnp.maximum(x.astype(jnp.float32), eps)       # clamp(min=eps)
    pooled = jnp.mean(jnp.power(xc, pv), axis=(-2, -1), keepdims=True)
    return jnp.power(pooled, 1.0 / pv).astype(x.dtype)


if __name__ == "__main__":
    key = jax.random.PRNGKey(0)
    k1, k2 = jax.random.split(key)
    eps = 1e-6

    # Case 1: module defaults (p = 3 -> VPU fast path), single-step grid.
    N, C, H, W = 2, 4, 16, 16
    x1 = jax.random.normal(k1, (N, C, H, W), dtype=jnp.float32)
    p3 = jnp.ones((1,), dtype=jnp.float32) * 3.0        # GeM.__init__ default
    out1 = jax.block_until_ready(gem_pallas(x1, p3, eps=eps))
    ref1 = gem_reference(x1, p3, eps=eps)
    assert out1.shape == (N, C, 1, 1), out1.shape
    assert jnp.allclose(out1, ref1, rtol=1e-4, atol=1e-5), (
        f"p=3 max abs err = {jnp.max(jnp.abs(out1 - ref1))}"
    )

    # Case 2: non-integer p (general exp/log path) + multi-step HW reduction
    # with a masked tail (hw = 144 split into 128 + 16).
    N2, C2, H2, W2 = 2, 3, 12, 12
    x2 = jax.random.normal(k2, (N2, C2, H2, W2), dtype=jnp.float32)
    p_gen = jnp.ones((1,), dtype=jnp.float32) * 2.5
    out2 = jax.block_until_ready(gem_pallas(x2, p_gen, eps=eps, max_tile_hw=128))
    ref2 = gem_reference(x2, p_gen, eps=eps)
    assert out2.shape == (N2, C2, 1, 1), out2.shape
    assert jnp.allclose(out2, ref2, rtol=1e-4, atol=1e-5), (
        f"p=2.5 max abs err = {jnp.max(jnp.abs(out2 - ref2))}"
    )

    print("KERNEL_OK")
</pallas_src>

<mosaic_0001>
module attributes {stable_mosaic.version = 11 : i64} {
  func.func @_gem_kernel(%arg0: i32, %arg1: i32, %arg2: memref<1xf32, #tpu.memory_space<smem>>, %arg3: memref<8x256xf32, #tpu.memory_space<vmem>>, %arg4: memref<1x8xf32, #tpu.memory_space<vmem>>, %arg5: memref<8x1xf32, #tpu.memory_space<vmem>>) attributes {dimension_semantics = [#tpu.dimension_semantics<parallel>, #tpu.dimension_semantics<arbitrary>], iteration_bounds = array<i64: 1, 1>, scalar_prefetch = 0 : i64, scratch_operands = 1 : i64, tpu.core_type = #tpu.core_type<tc>, window_params = [{transform_indices = @transform_0, window_bounds = array<i64: 1>}, {transform_indices = @transform_1, window_bounds = array<i64: 8, 256>}, {transform_indices = @transform_2, window_bounds = array<i64: 1, 8>}]} {
    %c0_i32 = arith.constant 0 : i32
    %0 = arith.cmpi eq, %arg1, %c0_i32 : i32
    %1 = arith.extui %0 : i1 to i32
    %c0_i32_0 = arith.constant 0 : i32
    %2 = arith.cmpi ne, %1, %c0_i32_0 : i32
    scf.if %2 {
      %cst_8 = arith.constant 0.000000e+00 : f32
      %16 = vector.broadcast %cst_8 : f32 to vector<8x1xf32>
      %c0_9 = arith.constant 0 : index
      %c0_10 = arith.constant 0 : index
      %17 = vector.load %arg5[%c0_9, %c0_10] : memref<8x1xf32, #tpu.memory_space<vmem>>, vector<8x1xf32>
      tpu.vector_store %arg5[%c0_9, %c0_10], %16 {strides = array<i32>} : memref<8x1xf32, #tpu.memory_space<vmem>>, vector<8x1xf32>,
    } else {
    }
    %c0 = arith.constant 0 : index
    %3 = memref.load %arg2[%c0] : memref<1xf32, #tpu.memory_space<smem>>
    %c0_1 = arith.constant 0 : index
    %c0_2 = arith.constant 0 : index
    %4 = vector.load %arg3[%c0_1, %c0_2] : memref<8x256xf32, #tpu.memory_space<vmem>>, vector<8x256xf32>
    %cst = arith.constant 9.99999997E-7 : f32
    %5 = vector.broadcast %cst : f32 to vector<8x256xf32>
    %6 = arith.maximumf %4, %5 : vector<8x256xf32>
    %cst_3 = arith.constant 3.000000e+00 : f32
    %7 = arith.cmpf oeq, %3, %cst_3 : f32
    %8 = arith.extui %7 : i1 to i32
    %c0_i32_4 = arith.constant 0 : i32
    %9 = arith.cmpi ne, %8, %c0_i32_4 : i32
    scf.if %9 {
      %16 = arith.mulf %6, %6 : vector<8x256xf32>
      %17 = arith.mulf %16, %6 : vector<8x256xf32>
      %c0_8 = arith.constant 0 : index
      %c0_9 = arith.constant 0 : index
      %18 = vector.load %arg5[%c0_8, %c0_9] : memref<8x1xf32, #tpu.memory_space<vmem>>, vector<8x1xf32>
      %cst_10 = arith.constant dense<0.000000e+00> : vector<8xf32>
      %19 = vector.multi_reduction <add>, %17, %cst_10 [1] : vector<8x256xf32> to vector<8xf32>
      %20 = vector.shape_cast %19 : vector<8xf32> to vector<8x1xf32>
      %21 = arith.addf %18, %20 : vector<8x1xf32>
      %c0_11 = arith.constant 0 : index
      %c0_12 = arith.constant 0 : index
      %22 = vector.load %arg5[%c0_11, %c0_12] : memref<8x1xf32, #tpu.memory_space<vmem>>, vector<8x1xf32>
      tpu.vector_store %arg5[%c0_11, %c0_12], %21 {strides = array<i32>} : memref<8x1xf32, #tpu.memory_space<vmem>>, vector<8x1xf32>,
    } else {
    }
    %true = arith.constant true
    %10 = arith.xori %7, %true : i1
    %11 = arith.extui %10 : i1 to i32
    %c0_i32_5 = arith.constant 0 : i32
    %12 = arith.cmpi ne, %11, %c0_i32_5 : i32
    scf.if %12 {
      %16 = math.log %6 : vector<8x256xf32>
      %17 = vector.broadcast %3 : f32 to vector<8x256xf32>
      %18 = arith.mulf %17, %16 : vector<8x256xf32>
      %19 = math.exp %18 : vector<8x256xf32>
      %c0_8 = arith.constant 0 : index
      %c0_9 = arith.constant 0 : index
      %20 = vector.load %arg5[%c0_8, %c0_9] : memref<8x1xf32, #tpu.memory_space<vmem>>, vector<8x1xf32>
      %cst_10 = arith.constant dense<0.000000e+00> : vector<8xf32>
      %21 = vector.multi_reduction <add>, %19, %cst_10 [1] : vector<8x256xf32> to vector<8xf32>
      %22 = vector.shape_cast %21 : vector<8xf32> to vector<8x1xf32>
      %23 = arith.addf %20, %22 : vector<8x1xf32>
      %c0_11 = arith.constant 0 : index
      %c0_12 = arith.constant 0 : index
      %24 = vector.load %arg5[%c0_11, %c0_12] : memref<8x1xf32, #tpu.memory_space<vmem>>, vector<8x1xf32>
      tpu.vector_store %arg5[%c0_11, %c0_12], %23 {strides = array<i32>} : memref<8x1xf32, #tpu.memory_space<vmem>>, vector<8x1xf32>,
    } else {
    }
    %c0_i32_6 = arith.constant 0 : i32
    %13 = arith.cmpi eq, %arg1, %c0_i32_6 : i32
    %14 = arith.extui %13 : i1 to i32
    %c0_i32_7 = arith.constant 0 : i32
    %15 = arith.cmpi ne, %14, %c0_i32_7 : i32
    scf.if %15 {
      %c0_8 = arith.constant 0 : index
      %c0_9 = arith.constant 0 : index
      %16 = vector.load %arg5[%c0_8, %c0_9] : memref<8x1xf32, #tpu.memory_space<vmem>>, vector<8x1xf32>
      %cst_10 = arith.constant 3.906250e-03 : f32
      %17 = vector.broadcast %cst_10 : f32 to vector<8x1xf32>
      %18 = arith.mulf %16, %17 : vector<8x1xf32>
      %19 = math.log %18 : vector<8x1xf32>
      %cst_11 = arith.constant 1.000000e+00 : f32
      %20 = arith.divf %cst_11, %3 : f32
      %21 = vector.broadcast %20 : f32 to vector<8x1xf32>
      %22 = arith.mulf %19, %21 : vector<8x1xf32>
      %23 = math.exp %22 : vector<8x1xf32>
      %24 = vector.shape_cast %23 : vector<8x1xf32> to vector<1x8xf32>
      %c0_12 = arith.constant 0 : index
      %c0_13 = arith.constant 0 : index
      %25 = vector.load %arg4[%c0_12, %c0_13] : memref<1x8xf32, #tpu.memory_space<vmem>>, vector<1x8xf32>
      tpu.vector_store %arg4[%c0_12, %c0_13], %24 {strides = array<i32>} : memref<1x8xf32, #tpu.memory_space<vmem>>, vector<1x8xf32>,
    } else {
    }
    return
  }
  func.func @transform_0(%arg0: i32, %arg1: i32) -> i32 {
    %c0_i32 = arith.constant 0 : i32
    %c0_i32_0 = arith.constant 0 : i32
    return %c0_i32 : i32
  }
  func.func @transform_1(%arg0: i32, %arg1: i32) -> (i32, i32) {
    %c0_i32 = arith.constant 0 : i32
    return %arg0, %arg1 : i32, i32
  }
  func.func @transform_2(%arg0: i32, %arg1: i32) -> (i32, i32) {
    %c0_i32 = arith.constant 0 : i32
    %c0_i32_0 = arith.constant 0 : i32
    return %c0_i32, %arg0 : i32, i32
  }
}

</mosaic_0001>

<bundles_post_ra>
// kernel: tpu_custom_call.1
= control target key start
LH: loop header
LB: loop body
LE: loop exit
PB: predicated region body
PF: predicated region fallthrough
CT: control target
= control target key end

     0   :  { %8 = vsyncpa [#allocation5], 0  ;;  %s224_s0 = inlined_call_operand.<no memory space> [shape: f32[1], index: 0, kind: input, shape index: {}]   ;;  %s225_s1 = inlined_call_operand.hbm [shape: f32[8,256], index: 1, kind: input, shape index: {}]   ;;  %s226_s2 = inlined_call_operand.hbm [shape: f32[1,8], index: 2, kind: output, shape index: {}]  }
   0x1   :  { %9 = vsyncpa [#allocation6], 0  ;;  %s179_s9 = smov [#allocation4]  }
   0x2   :  { %s18_s10 = sshll.u32 %s179_s9, 4  ;;  %s19_s10 = int_to_ptr.vmem [resolvable:$true] %s18_s10 }
   0x3   :  { %s143_s11 = scalar_lea.vmem %s19_s10, 256  ;;  %p148_p1 = scmp.lt.s32.totalorder %s19_s10, %s19_s10 }
   0x4   :  { %p144_p0 = scmp.ne.s32.totalorder %s19_s10, %s143_s11  ;;  %p149_p2 = scmp.lt.s32.totalorder %s143_s11, %s143_s11 }
   0x6   :  { %p150_p3 = por %p149_p2, %p148_p1 }
   0x8   :  { %p151_p4 = pnand %p150_p3, %p144_p0 }
   0xa   :  { %154 = shalt.err (!%p151_p4)
}
   0xb   :  { %21 = dma.hbm_to_vmem [thread:$0]  %s225_s1, 256, %s19_s10, [#allocation5]  }
   0xc   :  { %175 = dma.done.wait [#allocation5], 256  }
   0xd   :  { %176 = vsyncadd [#allocation5], 4294967040  ;;  %vm29_vm0 = vcmask 7168   ;;  %p36_p5 = scmp.eq.f32.partialorder %s224_s0, 3.0  ;;  %v180_v0 = vmov 0.0   ;;  %v32_v1 = vld [vmem:[#allocation4] sm:$0xff] }
   0xe   :  { %30 = vst.msk [vmem:[#allocation2] sm:$0xff] %vm29_vm0, %v180_v0  ;;  %v33_v2 = vld [vmem:[#allocation4 + $0x8] sm:$0xff]  ;;  %v34_v3 = vmax.f32 %v32_v1, 1e-06 }
   0xf   :  { %v35_v4 = vmax.f32 %v33_v2, 1e-06  ;;  %39 = sbr.rel (!%p36_p5) target bundleno = 164 (0xa4), region = 21 }
  0x10   :  { %v40_v5 = vmul.f32 (%p36_p5), %v34_v3, %v34_v3 }
  0x11   :  { %v41_v6 = vmul.f32 (%p36_p5), %v35_v4, %v35_v4 }
  0x12   :  { %v42_v7 = vmul.f32 (%p36_p5), %v40_v5, %v34_v3 }
  0x13   :  { %v43_v8 = vmul.f32 (%p36_p5), %v41_v6, %v35_v4 }
  0x15   :  { %v45_v9 = vadd.f32 %v43_v8, %v42_v7  ;;  %v44_v10 = vld [vmem:[#allocation2] sm:$0xff] }
  0x17   :  { %46 = vadd.xlane.f32.xlu0 %v45_v9 }
  0xa0   :  { %v47_v11 = vpop.xlane.xlu0 %46 }
  0xa1   :  { %v48_v12 = vadd.f32 %v47_v11, %v44_v10 }
  0xa3   :  { %50 = vst.msk [vmem:[#allocation2] sm:$0xff] %vm29_vm0, %v48_v12 }
  0xa4 PF:  { %53 = sbr.rel (%p36_p5) target bundleno = 347 (0x15b), region = 25 }
  0xa9   :  { %120 = vlog2.f32 %v34_v3  ;;  %v58_v14 = vstv %s224_s0 }
  0xaa   :  { %122 = vlog2.f32 %v35_v4  ;;  %v65_v25 = vld [vmem:[#allocation2] sm:$0xff] }
  0xb6   :  { %v121_v13 = vpop.eup %120 }
  0xb7   :  { %v123_v15 = vpop.eup %122  ;;  %v55_v16 = vmul.f32 0.6931472, %v121_v13 }
  0xb8   :  { %v57_v17 = vmul.f32 0.6931472, %v123_v15 }
  0xb9   :  { %v59_v18 = vmul.f32 %v58_v14, %v55_v16 }
  0xba   :  { %v60_v19 = vmul.f32 %v58_v14, %v57_v17 }
  0xbb   :  { %v61_v20 = vmul.f32 1.442695, %v59_v18 }
  0xbc   :  { %v63_v21 = vmul.f32 1.442695, %v60_v19 }
  0xbd   :  { %124 = vpow2.f32 %v61_v20 }
  0xbe   :  { %126 = vpow2.f32 %v63_v21 }
  0xca   :  { %v125_v22 = vpop.eup %124 }
  0xcb   :  { %v127_v23 = vpop.eup %126 }
  0xcc   :  { %v66_v24 = vadd.f32 %v127_v23, %v125_v22 }
  0xce   :  { %67 = vadd.xlane.f32.xlu0 %v66_v24 }
 0x157   :  { %v68_v26 = vpop.xlane.xlu0 %67 }
 0x158   :  { %v69_v27 = vadd.f32 %v68_v26, %v65_v25 }
 0x15a   :  { %71 = vst.msk [vmem:[#allocation2] sm:$0xff] %vm29_vm0, %v69_v27 }
 0x15b PF:  { %v79_v28 = vstv %s224_s0  ;;  %v181_v29 = vmov 0   ;;  %v90_v39 = vlaneseq  ;;  %s182_s0 = smov [#allocation7]   ;;  %vm97_vm1 = vcmask 57344  }
 0x15c   :  { %129 = vrcp.f32 %v79_v28  ;;  %128 = vset.pattern.permute.xlu0 %v181_v29  ;;  %s105_s24 = sshll.u32 %s182_s0, 4  ;;  %s106_s24 = int_to_ptr.vmem [resolvable:$true] %s105_s24 }
 0x15d   :  { %v91_v40 = vand.u32 127, %v90_v39  ;;  %v93_v41 = vshrl.u32 %v90_v39, 7  ;;  %s155_s25 = scalar_lea.vmem %s106_s24, 16  ;;  %s159_s26 = scalar_lea.vmem %s106_s24, 32 }
 0x15e   :  { %p156_p6 = scmp.ne.s32.totalorder %s106_s24, %s155_s25  ;;  %p160_p7 = scmp.lt.s32.totalorder %s106_s24, %s106_s24 }
 0x15f   :  { %v94_v42 = vsub.s32 %v91_v40, %v93_v41  ;;  %p161_p8 = scmp.lt.s32.totalorder %s159_s26, %s155_s25 }
 0x161   :  { %v75_v31 = vld [vmem:[#allocation2] sm:$0xff]  ;;  %p162_p9 = por %p161_p8, %p160_p7 }
 0x162   :  { %v76_v32 = vmul.f32 0.00390625, %v75_v31 }
 0x163   :  { %p163_p10 = pnand %p162_p9, %p156_p6 }
 0x164   :  { %131 = vlog2.f32 %v76_v32 }
 0x169   :  { %v130_v30 = vpop.eup %129 }
 0x16a   :  { %114 = vpush %v130_v30 }
 0x171   :  { %v132_v33 = vpop.eup %131 }
 0x172   :  { %v78_v34 = vmul.f32 0.6931472, %v132_v33 }
 0x19b   :  { %s115_s23 = spop %114 }
 0x19c   :  { %v82_v35 = vstv %s115_s23 }
 0x19d   :  { %v83_v36 = vmul.f32 %v82_v35, %v78_v34 }
 0x19f   :  { %v84_v37 = vmul.f32 1.442695, %v83_v36 }
 0x1a1   :  { %133 = vpow2.f32 %v84_v37 }
 0x1ae   :  { %v134_v38 = vpop.eup %133 }
 0x1af   :  { %88 = vperm.xlu0 %128, %v134_v38  }
 0x22a   :  { %v89_v43 = vpop.permute.xlu0 %88 }
 0x22b   :  { %v95_v44 = vrot.slane %v89_v43, %v94_v42 }
 0x22d   :  { %98 = vst.msk [vmem:[#allocation7] sm:$0x1] %vm97_vm1, %v95_v44 }
 0x22e   :  { %166 = shalt.err (!%p163_p10)
}
 0x22f   :  { %108 = dma.vmem_to_hbm [thread:$0]  %s106_s24, 16, %s226_s2, [#allocation6]  }
 0x230   :  { %177 = dma.done.wait [#allocation6], 16  }
 0x231   :  { %178 = vsyncadd [#allocation6], 4294967280 }
 0x232   :  { %112 = vsyncpa [#allocation5], 1 }
 0x233   :  { %113 = vsyncpa [#allocation6], 1 }

</bundles_post_ra>
